<compile_context>
chip_gen: v7x
topology: tpu7x:2x2x1
jax: 0.10.0
libtpu: 0.0.40
codegen_flags: <defaults>
</compile_context>

<pallas_src>
import jax
import jax.numpy as jnp
from jax.experimental import pallas as pl
from jax.experimental.pallas import tpu as pltpu

_LANE = 128
_SUB = 16          # bf16 sublane packing: keep second-minor dims multiples of 16
_MAX_TK = 1024     # reduction (K) tile upper bound
_MAX_BM = 512      # batch tile upper bound


def _round_up(x, m):
    return ((x + m - 1) // m) * m


def _choose_bm(B):
    """Largest batch tile in {16,...,512} with small padding waste."""
    best = _SUB
    for cand in (32, 64, 128, 256, 512):
        if cand > _round_up(B, _SUB):
            break
        waste = _round_up(B, cand) - B
        if waste <= max(_SUB, B // 8):
            best = cand
    # Prefer >= 2 batch tiles so the "parallel" axis can feed both v7x cores.
    if best > _SUB and _round_up(B, best) // best == 1:
        best //= 2
    return best


def _choose_k_tile(K):
    """Reduction tile tk (multiple of 128, <= _MAX_TK) and padded K."""
    k128 = _round_up(K, _LANE)
    n_k = -(-k128 // _MAX_TK)
    tk = _round_up(-(-k128 // n_k), _LANE)
    return tk, n_k * tk


def _pllay_kernel(x_ref, wt_ref, bt_ref, wfc_ref, bfc_ref, out_ref, acc_ref):
    """One (batch tile, K tile) grid step.

    x_ref:   (bm, tk)   bf16 flattened-pixel tile (channel blocks contiguous)
    wt_ref:  (tk, Fp)   bf16 block-diagonal topo weights (K-tile slice)
    bt_ref:  (1, Fp)    f32 concatenated topo biases (lane-padded)
    wfc_ref: (Fp, Np)   bf16 classifier weight (lane-padded)
    bfc_ref: (1, Np)    f32 classifier bias (lane-padded)
    out_ref: (bm, Np)   f32 output tile
    acc_ref: (bm, Fp)   f32 accumulator scratch (persists across K steps)
    """
    k = pl.program_id(1)

    @pl.when(k == 0)
    def _init():
        acc_ref[...] = jnp.zeros_like(acc_ref)

    acc_ref[...] += jnp.dot(x_ref[...], wt_ref[...],
                            preferred_element_type=jnp.float32)

    @pl.when(k == pl.num_programs(1) - 1)
    def _finalize():
        h = jnp.maximum(acc_ref[...] + bt_ref[...], 0.0)        # f32 epilogue
        out = jnp.dot(h.astype(wfc_ref.dtype), wfc_ref[...],
                      preferred_element_type=jnp.float32) + bfc_ref[...]
        out_ref[...] = out.astype(out_ref.dtype)


def init_params(key, in_channels, spatial_dim, out_features, num_classes,
                dtype=jnp.float32):
    """Deterministic synthetic parameters (shapes implied by the module)."""
    k1, k2, k3, k4 = jax.random.split(key, 4)
    D = spatial_dim
    wt = 0.05 * jax.random.normal(k1, (in_channels, D, out_features), dtype)
    bt = 0.05 * jax.random.normal(k2, (in_channels, 1, out_features), dtype)
    wfc = 0.05 * jax.random.normal(
        k3, (in_channels * out_features, num_classes), dtype)
    bfc = 0.05 * jax.random.normal(k4, (1, num_classes), dtype)
    return wt, bt, wfc, bfc


def prepare_params(params, matmul_dtype=jnp.bfloat16):
    """One-time packing into kernel-friendly, lane-padded weights.

    Builds the block-diagonal topo weight (collapsing per-channel projections
    + concat into one matmul), zero-pads the feature / classifier dims to 128
    lanes and the reduction dim to a multiple of the K tile, and casts the
    matmul operands to bf16 (biases stay f32 for the f32 epilogue).
    """
    wt, bt, wfc, bfc = params
    C, D, F = wt.shape
    N = wfc.shape[-1]
    CF = C * F
    Fp = _round_up(CF, _LANE)
    Np = _round_up(N, _LANE)
    K = C * D
    tk, K_pad = _choose_k_tile(K)

    w_topo = jnp.zeros((K_pad, Fp), jnp.float32)
    b_topo = jnp.zeros((1, Fp), jnp.float32)
    for c in range(C):
        w_topo = w_topo.at[c * D:(c + 1) * D, c * F:(c + 1) * F].set(
            wt[c].astype(jnp.float32))
        b_topo = b_topo.at[:, c * F:(c + 1) * F].set(bt[c].astype(jnp.float32))

    w_fc = jnp.zeros((Fp, Np), jnp.float32).at[:CF, :N].set(
        wfc.astype(jnp.float32))
    b_fc = jnp.zeros((1, Np), jnp.float32).at[:, :N].set(
        bfc.astype(jnp.float32))

    return {
        "w_topo": w_topo.astype(matmul_dtype),
        "b_topo": b_topo,
        "w_fc": w_fc.astype(matmul_dtype),
        "b_fc": b_fc,
        "tk": tk,
        "K": K,
        "K_pad": K_pad,
        "num_classes": N,
    }


def base_pllay_05_forward(x, prepared):
    """x: (B, C, H, W) float32, NCHW like PyTorch. Returns (B, num_classes)."""
    w_topo = prepared["w_topo"]
    b_topo = prepared["b_topo"]
    w_fc = prepared["w_fc"]
    b_fc = prepared["b_fc"]
    tk = prepared["tk"]
    K_pad = prepared["K_pad"]
    N = prepared["num_classes"]

    B, C, H, W = x.shape
    K = C * H * W
    assert K == prepared["K"], "params were prepared for a different input size"
    Fp = w_topo.shape[-1]
    Np = w_fc.shape[-1]

    # Free reshape for contiguous NCHW: channel blocks are already contiguous.
    # Cast to bf16 so the MXU runs at bf16 rate and streamed bytes halve.
    x2d = x.reshape(B, K).astype(w_topo.dtype)

    bm = _choose_bm(B)
    B_pad = _round_up(B, bm)
    if B_pad != B or K_pad != K:
        x2d = jnp.pad(x2d, ((0, B_pad - B), (0, K_pad - K)))
    n_b = B_pad // bm
    n_k = K_pad // tk

    w_itemsize = jnp.dtype(w_topo.dtype).itemsize
    flops = 2 * B_pad * K_pad * Fp + 2 * B_pad * Fp * Np
    bytes_accessed = (
        B_pad * K_pad * w_itemsize
        + (w_topo.size + w_fc.size) * w_itemsize
        + (b_topo.size + b_fc.size) * 4
        + B_pad * Np * 4)

    # Explicit VMEM budget: streamed tiles double-buffered, constants single-
    # buffered, plus accumulator scratch and generous slack/headroom.
    vmem_bytes = (
        2 * bm * tk * w_itemsize        # x tile (double-buffered)
        + 2 * tk * Fp * w_itemsize      # w_topo K-slice (double-buffered)
        + Fp * 4                        # b_topo (single-buffered)
        + Fp * Np * w_itemsize          # w_fc   (single-buffered)
        + Np * 4                        # b_fc   (single-buffered)
        + 2 * bm * Np * 4               # out tile (double-buffered)
        + bm * Fp * 4)                  # accumulator scratch
    vmem_limit = min(max(2 * vmem_bytes + (2 << 20), 8 << 20), 64 << 20)

    out = pl.pallas_call(
        _pllay_kernel,
        out_shape=jax.ShapeDtypeStruct((B_pad, Np), jnp.float32),
        grid=(n_b, n_k),
        in_specs=[
            # x: new (batch, K) tile every step — default double-buffering.
            pl.BlockSpec((bm, tk), lambda i, k: (i, k)),
            # w_topo: streams along K — default double-buffering.
            pl.BlockSpec((tk, Fp), lambda i, k: (k, 0)),
            # Constant-across-grid operands: no need for a second buffer.
            pl.BlockSpec((1, Fp), lambda i, k: (0, 0),
                         pipeline_mode=pl.Buffered(1)),
            pl.BlockSpec((Fp, Np), lambda i, k: (0, 0),
                         pipeline_mode=pl.Buffered(1)),
            pl.BlockSpec((1, Np), lambda i, k: (0, 0),
                         pipeline_mode=pl.Buffered(1)),
        ],
        out_specs=pl.BlockSpec((bm, Np), lambda i, k: (i, 0)),
        scratch_shapes=[pltpu.VMEM((bm, Fp), jnp.float32)],
        compiler_params=pltpu.CompilerParams(
            dimension_semantics=("parallel", "arbitrary"),
            vmem_limit_bytes=int(vmem_limit)),
        cost_estimate=pl.CostEstimate(
            flops=int(flops), transcendentals=0,
            bytes_accessed=int(bytes_accessed)),
    )(x2d, w_topo, b_topo, w_fc, b_fc)

    # Padding rows / lanes are sliced off; never consume out[B:, :] or
    # out[:, N:] (padded rows contain relu(b_topo) @ W_fc + b_fc garbage).
    return out[:B, :N]


def _reference_forward(x, params):
    """Plain-JAX reference mirroring the module's per-channel structure.

    Uses the same bf16 matmul operands + f32 accumulation as the kernel so
    the correctness check stays tight.
    """
    wt, bt, wfc, bfc = params
    B, C, H, W = x.shape
    xf = x.reshape(B, C, H * W).astype(jnp.bfloat16)
    feats = []
    for c in range(C):
        f = jnp.dot(xf[:, c, :], wt[c].astype(jnp.bfloat16),
                    preferred_element_type=jnp.float32) + bt[c]
        feats.append(f)
    h = feats[0] if C == 1 else jnp.concatenate(feats, axis=-1)
    h = jnp.maximum(h, 0.0)
    return jnp.dot(h.astype(jnp.bfloat16), wfc.astype(jnp.bfloat16),
                   preferred_element_type=jnp.float32) + bfc


if __name__ == "__main__":
    # Small shapes consistent with the module: in_channels=3 branch.
    B, C, H, W = 2, 3, 16, 16
    out_features = 32
    num_classes = 10

    key = jax.random.PRNGKey(0)
    kx, kp = jax.random.split(key)
    x = jax.random.normal(kx, (B, C, H, W), jnp.float32)
    params = init_params(kp, C, H * W, out_features, num_classes)
    prepared = prepare_params(params)

    out = base_pllay_05_forward(x, prepared)
    out = jax.block_until_ready(out)

    ref = _reference_forward(x, params)
    assert out.shape == (B, num_classes)
    assert jnp.allclose(out, ref, atol=2e-3, rtol=2e-3), (
        float(jnp.abs(out - ref).max()))

    print("KERNEL_OK")
</pallas_src>

<mosaic_0001>
module attributes {stable_mosaic.version = 11 : i64} {
  func.func @_pllay_kernel(%arg0: i32, %arg1: i32, %arg2: memref<16x768xbf16, #tpu.memory_space<vmem>>, %arg3: memref<768x128xbf16, #tpu.memory_space<vmem>>, %arg4: memref<1x128xf32, #tpu.memory_space<vmem>>, %arg5: memref<128x128xbf16, #tpu.memory_space<vmem>>, %arg6: memref<1x128xf32, #tpu.memory_space<vmem>>, %arg7: memref<16x128xf32, #tpu.memory_space<vmem>>, %arg8: memref<16x128xf32, #tpu.memory_space<vmem>>) attributes {dimension_semantics = [#tpu.dimension_semantics<parallel>, #tpu.dimension_semantics<arbitrary>], iteration_bounds = array<i64: 1, 1>, scalar_prefetch = 0 : i64, scratch_operands = 1 : i64, tpu.core_type = #tpu.core_type<tc>, window_params = [{transform_indices = @transform_0, window_bounds = array<i64: 16, 768>}, {transform_indices = @transform_1, window_bounds = array<i64: 768, 128>}, {pipeline_mode = #tpu.pipeline_mode<synchronous>, transform_indices = @transform_2, window_bounds = array<i64: 1, 128>}, {pipeline_mode = #tpu.pipeline_mode<synchronous>, transform_indices = @transform_3, window_bounds = array<i64: 128, 128>}, {pipeline_mode = #tpu.pipeline_mode<synchronous>, transform_indices = @transform_4, window_bounds = array<i64: 1, 128>}, {transform_indices = @transform_5, window_bounds = array<i64: 16, 128>}]} {
    %c0_i32 = arith.constant 0 : i32
    %0 = arith.cmpi eq, %arg1, %c0_i32 : i32
    %1 = arith.extui %0 : i1 to i32
    %c0_i32_0 = arith.constant 0 : i32
    %2 = arith.cmpi ne, %1, %c0_i32_0 : i32
    scf.if %2 {
      %cst_10 = arith.constant 0.000000e+00 : f32
      %12 = vector.broadcast %cst_10 : f32 to vector<16x128xf32>
      %c0_11 = arith.constant 0 : index
      %c0_12 = arith.constant 0 : index
      %13 = vector.load %arg8[%c0_11, %c0_12] : memref<16x128xf32, #tpu.memory_space<vmem>>, vector<16x128xf32>
      tpu.vector_store %arg8[%c0_11, %c0_12], %12 {strides = array<i32>} : memref<16x128xf32, #tpu.memory_space<vmem>>, vector<16x128xf32>,
    } else {
    }
    %c0 = arith.constant 0 : index
    %c0_1 = arith.constant 0 : index
    %3 = vector.load %arg8[%c0, %c0_1] : memref<16x128xf32, #tpu.memory_space<vmem>>, vector<16x128xf32>
    %c0_2 = arith.constant 0 : index
    %c0_3 = arith.constant 0 : index
    %4 = vector.load %arg2[%c0_2, %c0_3] : memref<16x768xbf16, #tpu.memory_space<vmem>>, vector<16x768xbf16>
    %c0_4 = arith.constant 0 : index
    %c0_5 = arith.constant 0 : index
    %5 = vector.load %arg3[%c0_4, %c0_5] : memref<768x128xbf16, #tpu.memory_space<vmem>>, vector<768x128xbf16>
    %cst = arith.constant dense<0.000000e+00> : vector<16x128xf32>
    %6 = tpu.matmul %4, %5, %cst {dimension_numbers = #tpu.dot_dimension_numbers<[1], [0], [0], [1], [0, 0, 1, 1], [], []>} : vector<16x768xbf16>, vector<768x128xbf16>, vector<16x128xf32> -> vector<16x128xf32>
    %7 = arith.addf %3, %6 : vector<16x128xf32>
    %c0_6 = arith.constant 0 : index
    %c0_7 = arith.constant 0 : index
    %8 = vector.load %arg8[%c0_6, %c0_7] : memref<16x128xf32, #tpu.memory_space<vmem>>, vector<16x128xf32>
    tpu.vector_store %arg8[%c0_6, %c0_7], %7 {strides = array<i32>} : memref<16x128xf32, #tpu.memory_space<vmem>>, vector<16x128xf32>,
    %c0_i32_8 = arith.constant 0 : i32
    %9 = arith.cmpi eq, %arg1, %c0_i32_8 : i32
    %10 = arith.extui %9 : i1 to i32
    %c0_i32_9 = arith.constant 0 : i32
    %11 = arith.cmpi ne, %10, %c0_i32_9 : i32
    scf.if %11 {
      %c0_10 = arith.constant 0 : index
      %c0_11 = arith.constant 0 : index
      %12 = vector.load %arg8[%c0_10, %c0_11] : memref<16x128xf32, #tpu.memory_space<vmem>>, vector<16x128xf32>
      %c0_12 = arith.constant 0 : index
      %c0_13 = arith.constant 0 : index
      %13 = vector.load %arg4[%c0_12, %c0_13] : memref<1x128xf32, #tpu.memory_space<vmem>>, vector<1x128xf32>
      %14 = vector.broadcast %13 : vector<1x128xf32> to vector<16x128xf32>
      %15 = arith.addf %12, %14 : vector<16x128xf32>
      %cst_14 = arith.constant 0.000000e+00 : f32
      %16 = vector.broadcast %cst_14 : f32 to vector<16x128xf32>
      %17 = arith.maximumf %15, %16 : vector<16x128xf32>
      %18 = arith.truncf %17 : vector<16x128xf32> to vector<16x128xbf16>
      %c0_15 = arith.constant 0 : index
      %c0_16 = arith.constant 0 : index
      %19 = vector.load %arg5[%c0_15, %c0_16] : memref<128x128xbf16, #tpu.memory_space<vmem>>, vector<128x128xbf16>
      %cst_17 = arith.constant dense<0.000000e+00> : vector<16x128xf32>
      %20 = tpu.matmul %18, %19, %cst_17 {dimension_numbers = #tpu.dot_dimension_numbers<[1], [0], [0], [1], [0, 0, 1, 1], [], []>} : vector<16x128xbf16>, vector<128x128xbf16>, vector<16x128xf32> -> vector<16x128xf32>
      %c0_18 = arith.constant 0 : index
      %c0_19 = arith.constant 0 : index
      %21 = vector.load %arg6[%c0_18, %c0_19] : memref<1x128xf32, #tpu.memory_space<vmem>>, vector<1x128xf32>
      %22 = vector.broadcast %21 : vector<1x128xf32> to vector<16x128xf32>
      %23 = arith.addf %20, %22 : vector<16x128xf32>
      %c0_20 = arith.constant 0 : index
      %c0_21 = arith.constant 0 : index
      %24 = vector.load %arg7[%c0_20, %c0_21] : memref<16x128xf32, #tpu.memory_space<vmem>>, vector<16x128xf32>
      tpu.vector_store %arg7[%c0_20, %c0_21], %23 {strides = array<i32>} : memref<16x128xf32, #tpu.memory_space<vmem>>, vector<16x128xf32>,
    } else {
    }
    return
  }
  func.func @transform_0(%arg0: i32, %arg1: i32) -> (i32, i32) {
    %c0_i32 = arith.constant 0 : i32
    return %arg0, %arg1 : i32, i32
  }
  func.func @transform_1(%arg0: i32, %arg1: i32) -> (i32, i32) {
    %c0_i32 = arith.constant 0 : i32
    %c0_i32_0 = arith.constant 0 : i32
    return %arg1, %c0_i32 : i32, i32
  }
  func.func @transform_2(%arg0: i32, %arg1: i32) -> (i32, i32) {
    %c0_i32 = arith.constant 0 : i32
    %c0_i32_0 = arith.constant 0 : i32
    %c0_i32_1 = arith.constant 0 : i32
    return %c0_i32, %c0_i32_0 : i32, i32
  }
  func.func @transform_3(%arg0: i32, %arg1: i32) -> (i32, i32) {
    %c0_i32 = arith.constant 0 : i32
    %c0_i32_0 = arith.constant 0 : i32
    %c0_i32_1 = arith.constant 0 : i32
    return %c0_i32, %c0_i32_0 : i32, i32
  }
  func.func @transform_4(%arg0: i32, %arg1: i32) -> (i32, i32) {
    %c0_i32 = arith.constant 0 : i32
    %c0_i32_0 = arith.constant 0 : i32
    %c0_i32_1 = arith.constant 0 : i32
    return %c0_i32, %c0_i32_0 : i32, i32
  }
  func.func @transform_5(%arg0: i32, %arg1: i32) -> (i32, i32) {
    %c0_i32 = arith.constant 0 : i32
    %c0_i32_0 = arith.constant 0 : i32
    return %arg0, %c0_i32 : i32, i32
  }
}

</mosaic_0001>

<bundles_post_ra>
// kernel: tpu_custom_call.1
= control target key start
LH: loop header
LB: loop body
LE: loop exit
PB: predicated region body
PF: predicated region fallthrough
CT: control target
= control target key end

     0   :  { %10 = vsyncpa [#allocation4], 0  ;;  %s1199_s0 = inlined_call_operand.hbm [shape: bf16[16,768], index: 0, kind: input, shape index: {}]   ;;  %s1200_s1 = inlined_call_operand.hbm [shape: bf16[768,128], index: 1, kind: input, shape index: {}]   ;;  %s1201_s2 = inlined_call_operand.vmem [shape: f32[1,128], index: 2, kind: input, shape index: {}]   ;;  %s1202_s3 = inlined_call_operand.hbm [shape: bf16[128,128], index: 3, kind: input, shape index: {}]   ;;  %s1203_s4 = inlined_call_operand.vmem [shape: f32[1,128], index: 4, kind: input, shape index: {}]   ;;  %s1204_s5 = inlined_call_operand.hbm [shape: f32[16,128], index: 5, kind: output, shape index: {}]  }
   0x1   :  { %11 = vsyncpa [#allocation7], 0 }
   0x2   :  { %12 = vsyncpa [#allocation5], 0  ;;  %s1097_s18 = smov [#allocation6]   ;;  %s1003_s22 = scalar_lea.hbm %s1200_s1, 6144 }
   0x3   :  { %s30_s19 = sshll.u32 %s1097_s18, 4  ;;  %p1004_p0 = scmp.ne.s32.totalorder %s1200_s1, %s1003_s22  ;;  %s31_s19 = int_to_ptr.vmem [resolvable:$true] %s30_s19 }
   0x4   :  { %p1007_p1 = scmp.lt.u32.totalorder %s1003_s22, %s1200_s1 }
   0x6   :  { %p1009_p2 = pnand %p1007_p1, %p1004_p0 }
   0x8   :  { %1012 = shalt.err (!%p1009_p2)
}
   0x9   :  { %s1013_s27 = scalar_lea.vmem %s31_s19, 6144  ;;  %p1018_p4 = scmp.lt.s32.totalorder %s31_s19, %s31_s19 }
   0xa   :  { %p1014_p3 = scmp.ne.s32.totalorder %s31_s19, %s1013_s27  ;;  %p1019_p5 = scmp.lt.s32.totalorder %s1013_s27, %s1013_s27 }
   0xc   :  { %p1020_p6 = por %p1019_p5, %p1018_p4 }
   0xe   :  { %p1021_p7 = pnand %p1020_p6, %p1014_p3 }
  0x10   :  { %1024 = shalt.err (!%p1021_p7)
}
  0x11   :  { %s1098_s28 = smov 64   ;;  %s1099_s29 = smov 4  }
  0x12   :  { %36 = dma.hbm_to_vmem [thread:$0]  %s1200_s1, 6144, %s31_s19, [#allocation7], %s1098_s28, %s1098_s28, %s1099_s29  }
  0x13   :  { %s1100_s7 = smov [#allocation3]   ;;  %s1025_s11 = scalar_lea.hbm %s1199_s0, 768 }
  0x14   :  { %s18_s8 = sshll.u32 %s1100_s7, 4  ;;  %p1026_p8 = scmp.ne.s32.totalorder %s1199_s0, %s1025_s11  ;;  %s19_s8 = int_to_ptr.vmem [resolvable:$true] %s18_s8 }
  0x15   :  { %p1029_p9 = scmp.lt.u32.totalorder %s1025_s11, %s1199_s0 }
  0x17   :  { %p1031_p10 = pnand %p1029_p9, %p1026_p8 }
  0x19   :  { %1034 = shalt.err (!%p1031_p10)
}
  0x1a   :  { %s1035_s16 = scalar_lea.vmem %s19_s8, 768  ;;  %p1040_p12 = scmp.lt.s32.totalorder %s19_s8, %s19_s8 }
  0x1b   :  { %p1036_p11 = scmp.ne.s32.totalorder %s19_s8, %s1035_s16  ;;  %p1041_p13 = scmp.lt.s32.totalorder %s1035_s16, %s1035_s16 }
  0x1d   :  { %p1042_p0 = por %p1041_p13, %p1040_p12 }
  0x1f   :  { %p1043_p1 = pnand %p1042_p0, %p1036_p11 }
  0x21   :  { %1046 = shalt.err (!%p1043_p1)
}
  0x22   :  { %s1101_s1 = smov 384   ;;  %s1102_s17 = smov 24  }
  0x23   :  { %24 = dma.hbm_to_vmem [thread:$0]  %s1199_s0, 768, %s19_s8, [#allocation4], %s1101_s1, %s1101_s1, %s1102_s17  }
  0x24   :  { %s1103_s20 = smov [#allocation8]   ;;  %s1047_s24 = scalar_lea.hbm %s1202_s3, 1024 }
  0x25   :  { %s44_s21 = sshll.u32 %s1103_s20, 4  ;;  %p1048_p2 = scmp.ne.s32.totalorder %s1202_s3, %s1047_s24  ;;  %s45_s21 = int_to_ptr.vmem [resolvable:$true] %s44_s21 }
  0x26   :  { %p1051_p3 = scmp.lt.u32.totalorder %s1047_s24, %s1202_s3 }
  0x28   :  { %p1053_p4 = pnand %p1051_p3, %p1048_p2 }
  0x2a   :  { %1056 = shalt.err (!%p1053_p4)
}
  0x2b   :  { %s1057_s6 = scalar_lea.vmem %s45_s21, 1024  ;;  %p1062_p6 = scmp.lt.s32.totalorder %s45_s21, %s45_s21 }
  0x2c   :  { %p1058_p5 = scmp.ne.s32.totalorder %s45_s21, %s1057_s6  ;;  %p1063_p7 = scmp.lt.s32.totalorder %s1057_s6, %s1057_s6 }
  0x2e   :  { %p1064_p8 = por %p1063_p7, %p1062_p6 }
  0x30   :  { %p1065_p9 = pnand %p1064_p8, %p1058_p5 }
  0x32   :  { %1068 = shalt.err (!%p1065_p9)
}
  0x33   :  { %50 = dma.hbm_to_vmem [thread:$0]  %s1202_s3, 1024, %s45_s21, [#allocation7], %s1098_s28, %s1098_s28, %s1099_s29  }
  0x34   :  { %1091 = dma.done.wait [#allocation4], 768  }
  0x35   :  { %1092 = vsyncadd [#allocation4], 4294966528 }
  0x36   :  { %1093 = dma.done.wait [#allocation7], 7168  }
  0x37   :  { %1094 = vsyncadd [#allocation7], 4294960128  ;;  %v938_v0 = vld [vmem:[#allocation6 + $0x40] sm:$0xff]   ;;  %v942_v4 = vld [vmem:[#allocation6 + $0x48] sm:$0xff]   ;;  %v1104_v55 = vmov 0.0   ;;  %vm1105_vm0 = vmmov 0  }
  0x38   :  { %v939_v1 = vld [vmem:[#allocation6 + $0xc0] sm:$0xff]   ;;  %831 = vmatprep.subr.bf16.mxu0 %v938_v0  ;;  %v943_v5 = vld [vmem:[#allocation6 + $0xc8] sm:$0xff]   ;;  %v946_v8 = vld [vmem:[#allocation6 + $0x50] sm:$0xff]   ;;  %s1106_s9 = smov [#allocation9]  }
  0x39   :  { %v940_v2 = vld [vmem:[#allocation6] sm:$0xff]   ;;  %853 = vmatprep.subr.bf16.mxu1 %v939_v1  ;;  %v944_v6 = vld [vmem:[#allocation6 + $0x8] sm:$0xff]   ;;  %v947_v9 = vld [vmem:[#allocation6 + $0xd0] sm:$0xff]   ;;  %s754_s10 = sshll.u32 %s1106_s9, 4  ;;  %s755_s10 = int_to_ptr.vmem [resolvable:$true] %s754_s10 }
  0x3a   :  { %v941_v3 = vld [vmem:[#allocation6 + $0x80] sm:$0xff]   ;;  %832 = vmatpush3.bf16.msra.mxu0 %v940_v2  ;;  %v945_v7 = vld [vmem:[#allocation6 + $0x88] sm:$0xff]   ;;  %v948_v10 = vld [vmem:[#allocation6 + $0x10] sm:$0xff]   ;;  %p1074_p11 = scmp.lt.s32.totalorder %s755_s10, %s755_s10 }
  0x3b   :  { %854 = vmatpush3.bf16.msra.mxu1 %v941_v3  ;;  %833 = vmatprep.subr.bf16.mxu0 %v942_v4  ;;  %v949_v11 = vld [vmem:[#allocation6 + $0x90] sm:$0xff]   ;;  %v950_v12 = vld [vmem:[#allocation6 + $0x58] sm:$0xff]   ;;  %v954_v16 = vld [vmem:[#allocation6 + $0x60] sm:$0xff]  }
  0x3c   :  { %855 = vmatprep.subr.bf16.mxu1 %v943_v5  ;;  %v951_v13 = vld [vmem:[#allocation6 + $0xd8] sm:$0xff]   ;;  %v955_v17 = vld [vmem:[#allocation6 + $0xe0] sm:$0xff]   ;;  %v958_v20 = vld [vmem:[#allocation6 + $0x68] sm:$0xff]  }
  0x3d   :  { %v952_v14 = vld [vmem:[#allocation6 + $0x18] sm:$0xff]   ;;  %v956_v18 = vld [vmem:[#allocation6 + $0x20] sm:$0xff]   ;;  %v959_v21 = vld [vmem:[#allocation6 + $0xe8] sm:$0xff]  }
  0x3e   :  { %834 = vmatpush3.bf16.msra.mxu0 %v944_v6  ;;  %v953_v15 = vld [vmem:[#allocation6 + $0x98] sm:$0xff]   ;;  %v957_v19 = vld [vmem:[#allocation6 + $0xa0] sm:$0xff]   ;;  %v960_v22 = vld [vmem:[#allocation6 + $0x28] sm:$0xff]  }
  0x3f   :  { %856 = vmatpush3.bf16.msra.mxu1 %v945_v7  ;;  %835 = vmatprep.subr.bf16.mxu0 %v946_v8  ;;  %v961_v23 = vld [vmem:[#allocation6 + $0xa8] sm:$0xff]   ;;  %v962_v24 = vld [vmem:[#allocation6 + $0x70] sm:$0xff]   ;;  %v966_v28 = vld [vmem:[#allocation6 + $0x78] sm:$0xff]  }
  0x40   :  { %857 = vmatprep.subr.bf16.mxu1 %v947_v9  ;;  %v963_v25 = vld [vmem:[#allocation6 + $0xf0] sm:$0xff]   ;;  %v967_v29 = vld [vmem:[#allocation6 + $0xf8] sm:$0xff]   ;;  %v976_v36 = vld [vmem:[#allocation6 + $0x140] sm:$0xff]  }
  0x41   :  { %v964_v26 = vld [vmem:[#allocation6 + $0x30] sm:$0xff]   ;;  %v968_v30 = vld [vmem:[#allocation6 + $0x38] sm:$0xff]   ;;  %v977_v37 = vld [vmem:[#allocation6 + $0x100] sm:$0xff]  }
  0x42   :  { %836 = vmatpush3.bf16.msra.mxu0 %v948_v10  ;;  %v965_v27 = vld [vmem:[#allocation6 + $0xb0] sm:$0xff]   ;;  %v969_v31 = vld [vmem:[#allocation6 + $0xb8] sm:$0xff]   ;;  %v978_v38 = vld [vmem:[#allocation6 + $0x148] sm:$0xff]  }
  0x43   :  { %858 = vmatpush3.bf16.msra.mxu1 %v949_v11  ;;  %837 = vmatprep.subr.bf16.mxu0 %v950_v12  ;;  %v970_v32 = vld [vmem:[#allocation3] ss:$24 sps:$4 sm:$0xff]   ;;  %v972_v33 = vld [vmem:[#allocation3 + $0x4] ss:$24 sps:$4 sm:$0xff]   ;;  %v982_v42 = vld [vmem:[#allocation6 + $0x158] sm:$0xff]  }
  0x44   :  { %859 = vmatprep.subr.bf16.mxu1 %v951_v13  ;;  %v973_v34 = vld [vmem:[#allocation3 + $0x8] ss:$24 sps:$4 sm:$0xff]   ;;  %v975_v35 = vld [vmem:[#allocation3 + $0xc] ss:$24 sps:$4 sm:$0xff]   ;;  %523 = vmatprep.mubr.bf16.mxu0 %v972_v33  ;;  %v979_v39 = vld [vmem:[#allocation6 + $0x108] sm:$0xff]  }
  0x45   :  { %564 = vmatprep.mubr.bf16.mxu1 %v975_v35  ;;  %v980_v40 = vld [vmem:[#allocation6 + $0x150] sm:$0xff]   ;;  %v983_v43 = vld [vmem:[#allocation6 + $0x118] sm:$0xff]   ;;  %v984_v44 = vld [vmem:[#allocation6 + $0x160] sm:$0xff]  }
  0x46   :  { %838 = vmatpush3.bf16.msra.mxu0 %v952_v14  ;;  %v981_v41 = vld [vmem:[#allocation6 + $0x110] sm:$0xff]   ;;  %v985_v45 = vld [vmem:[#allocation6 + $0x120] sm:$0xff]   ;;  %v986_v46 = vld [vmem:[#allocation6 + $0x168] sm:$0xff]  }
  0x47   :  { %860 = vmatpush3.bf16.msra.mxu1 %v953_v15  ;;  %839 = vmatprep.subr.bf16.mxu0 %v954_v16  ;;  %v994_v47 = vld [vmem:[#allocation3 + $0x14] ss:$24 sps:$4 sm:$0xff]   ;;  %v987_v48 = vld [vmem:[#allocation6 + $0x128] sm:$0xff]   ;;  %v988_v49 = vld [vmem:[#allocation6 + $0x170] sm:$0xff]  }
  0x48   :  { %861 = vmatprep.subr.bf16.mxu1 %v955_v17  ;;  %v989_v50 = vld [vmem:[#allocation6 + $0x130] sm:$0xff]   ;;  %v990_v51 = vld [vmem:[#allocation6 + $0x178] sm:$0xff]   ;;  %v995_v54 = vld [vmem:[#allocation8] sm:$0xff]  }
  0x49   :  { %v991_v52 = vld [vmem:[#allocation6 + $0x138] sm:$0xff]   ;;  %v996_v56 = vld [vmem:[#allocation8 + $0x8] sm:$0xff]   ;;  %v997_v57 = vld [vmem:[#allocation8 + $0x10] sm:$0xff]  }
  0x4a   :  { %840 = vmatpush3.bf16.msra.mxu0 %v956_v18  ;;  %v992_v53 = vld [vmem:[#allocation3 + $0x10] ss:$24 sps:$4 sm:$0xff]   ;;  %v1000_v60 = vld [vmem:[#allocation8 + $0x28] sm:$0xff]   ;;  %v1001_v61 = vld [vmem:[#allocation8 + $0x30] sm:$0xff]  }
  0x4b   :  { %862 = vmatpush3.bf16.msra.mxu1 %v957_v19  ;;  %841 = vmatprep.subr.bf16.mxu0 %v958_v20  ;;  %v998_v58 = vld [vmem:[#allocation8 + $0x18] sm:$0xff]   ;;  %v999_v59 = vld [vmem:[#allocation8 + $0x20] sm:$0xff]   ;;  %v821_v17 = vld [vmem:[%s1201_s2] ss:$0 sm:$0xff]  ;;  %s1069_s2 = scalar_lea.vmem %s755_s10, 256 }
  0x4c   :  { %863 = vmatprep.subr.bf16.mxu1 %v959_v21  ;;  %v1002_v62 = vld [vmem:[#allocation8 + $0x38] sm:$0xff]   ;;  %p1070_p10 = scmp.ne.s32.totalorder %s755_s10, %s1069_s2  ;;  %p1075_p12 = scmp.lt.s32.totalorder %s1069_s2, %s1069_s2 }
  0x4e   :  { %842 = vmatpush3.bf16.msra.mxu0 %v960_v22  ;;  %p1076_p13 = por %p1075_p12, %p1074_p11 }
  0x4f   :  { %864 = vmatpush3.bf16.msra.mxu1 %v961_v23  ;;  %843 = vmatprep.subr.bf16.mxu0 %v962_v24 }
  0x50   :  { %865 = vmatprep.subr.bf16.mxu1 %v963_v25  ;;  %p1077_p0 = pnand %p1076_p13, %p1070_p10 }
  0x52   :  { %844 = vmatpush3.bf16.msra.mxu0 %v964_v26 }
  0x53   :  { %866 = vmatpush3.bf16.msra.mxu1 %v965_v27  ;;  %845 = vmatprep.subr.bf16.mxu0 %v966_v28  ;;  %v822_v27 = vld [vmem:[%s1203_s4] ss:$0 sm:$0xff] }
  0x54   :  { %867 = vmatprep.subr.bf16.mxu1 %v967_v29 }
  0x56   :  { %846 = vmatpush3.bf16.msra.mxu0 %v968_v30 }
  0x57   :  { %868 = vmatpush3.bf16.msra.mxu1 %v969_v31  ;;  %875 = vmatprep.subr.bf16.mxu0 %v976_v36 }
  0x58   :  { %906 = vmatprep.subr.bf16.mxu1 %v1104_v55 }
  0x59   :  { %524 = vmatmul.mubr.bf16.vlgmr.msra.gmra.mrb[0].mxu0 %v970_v32 }
  0x5a   :  { %565 = vmatmul.mubr.bf16.vlgmr.msra.gmra.mrb[0].mxu1 %v973_v34  ;;  %876 = vmatpush3.bf16.msra.mxu0 %v977_v37 }
  0x5b   :  { %877 = vmatprep.subr.bf16.mxu0 %v978_v38  ;;  %605 = vmatprep.mubr.bf16.mxu0 %v994_v47 }
  0x5c   :  { %907 = vmatpush3.bf16.msra.mxu1 %v995_v54  ;;  %922 = vmatprep.mubr.msk.bf16.mxu1 %vm1105_vm0, %v1104_v55 }
  0x5d   :  { %908 = vmatprep.subr.bf16.mxu1 %v1104_v55 }
  0x5e   :  { %878 = vmatpush3.bf16.msra.mxu0 %v979_v39 }
  0x5f   :  { %879 = vmatprep.subr.bf16.mxu0 %v980_v40 }
  0x60   :  { %909 = vmatpush3.bf16.msra.mxu1 %v996_v56 }
  0x61   :  { %910 = vmatprep.subr.bf16.mxu1 %v1104_v55 }
  0x62   :  { %880 = vmatpush3.bf16.msra.mxu0 %v981_v41 }
  0x63   :  { %881 = vmatprep.subr.bf16.mxu0 %v982_v42 }
  0x64   :  { %911 = vmatpush3.bf16.msra.mxu1 %v997_v57 }
  0x65   :  { %912 = vmatprep.subr.bf16.mxu1 %v1104_v55 }
  0x66   :  { %882 = vmatpush3.bf16.msra.mxu0 %v983_v43 }
  0x67   :  { %883 = vmatprep.subr.bf16.mxu0 %v984_v44 }
  0x68   :  { %913 = vmatpush3.bf16.msra.mxu1 %v998_v58 }
  0x69   :  { %914 = vmatprep.subr.bf16.mxu1 %v1104_v55 }
  0x6a   :  { %884 = vmatpush3.bf16.msra.mxu0 %v985_v45 }
  0x6b   :  { %885 = vmatprep.subr.bf16.mxu0 %v986_v46 }
  0x6c   :  { %915 = vmatpush3.bf16.msra.mxu1 %v999_v59 }
  0x6d   :  { %916 = vmatprep.subr.bf16.mxu1 %v1104_v55 }
  0x6e   :  { %886 = vmatpush3.bf16.msra.mxu0 %v987_v48 }
  0x6f   :  { %887 = vmatprep.subr.bf16.mxu0 %v988_v49 }
  0x70   :  { %917 = vmatpush3.bf16.msra.mxu1 %v1000_v60 }
  0x71   :  { %918 = vmatprep.subr.bf16.mxu1 %v1104_v55 }
  0x72   :  { %888 = vmatpush3.bf16.msra.mxu0 %v989_v50 }
  0x73   :  { %889 = vmatprep.subr.bf16.mxu0 %v990_v51 }
  0x74   :  { %919 = vmatpush3.bf16.msra.mxu1 %v1001_v61 }
  0x75   :  { %920 = vmatprep.subr.bf16.mxu1 %v1104_v55 }
  0x76   :  { %890 = vmatpush3.bf16.msra.mxu0 %v991_v52 }
  0x78   :  { %921 = vmatpush3.bf16.msra.mxu1 %v1002_v62 }
  0x79   :  { %606 = vmatmul.mubr.bf16.vlgmr.msra.gmra.mrb[4].mxu0 %v992_v53 }
 0x12c   :  { %v847_v63 = vpop.f32.mrb[0].mxu0 }
 0x12d   :  { %v869_v0 = vpop.f32.mrb[0].mxu1  ;;  %v848_v1 = vpop.f32.mrb[1].mxu0 }
 0x12e   :  { %v849_v2 = vadd.f32 %v848_v1, %v847_v63  ;;  %v870_v3 = vpop.f32.mrb[1].mxu1  ;;  %v850_v4 = vpop.f32.mrb[2].mxu0 }
 0x12f   :  { %v871_v5 = vadd.f32 %v870_v3, %v869_v0  ;;  %v872_v6 = vpop.f32.mrb[2].mxu1  ;;  %v851_v7 = vpop.f32.mrb[3].mxu0 }
 0x130   :  { %v852_v8 = vadd.f32 %v851_v7, %v850_v4  ;;  %v873_v9 = vpop.f32.mrb[3].mxu1 }
 0x131   :  { %v567_v10 = vadd.f32 %v871_v5, %v849_v2  ;;  %v874_v11 = vadd.f32 %v873_v9, %v872_v6 }
 0x133   :  { %v570_v12 = vadd.f32 %v874_v11, %v852_v8 }
 0x14c   :  { %v891_v13 = vpop.f32.mrb[4].mxu0 }
 0x14d   :  { %v892_v14 = vpop.f32.mrb[5].mxu0 }
 0x14e   :  { %v893_v15 = vadd.f32 %v892_v14, %v891_v13  ;;  %v894_v16 = vpop.f32.mrb[6].mxu0 }
 0x14f   :  { %v895_v18 = vpop.f32.mrb[7].mxu0 }
 0x150   :  { %v608_v19 = vadd.f32 %v893_v15, %v567_v10  ;;  %v896_v20 = vadd.f32 %v895_v18, %v894_v16 }
 0x152   :  { %v630_v21 = vadd.f32 %v821_v17, %v608_v19  ;;  %v611_v22 = vadd.f32 %v896_v20, %v570_v12 }
 0x154   :  { %v631_v23 = vadd.f32 %v821_v17, %v611_v22  ;;  %v632_v24 = vmax.f32 %v630_v21, 0.0 }
 0x156   :  { %v633_v25 = vmax.f32 %v631_v23, 0.0 }
 0x158   :  { %v634_v26 = vpack.c.bf16 %v633_v25, %v632_v24 }
 0x15a   :  { %923 = vmatmul.mubr.bf16.vlgmr.msra.gmra.mrb[4].mxu1 %v634_v26 }
 0x22d   :  { %v740_v28 = vpop.f32.mrb[4].mxu1 }
 0x22e   :  { %v741_v29 = vadd.f32 %v822_v27, %v740_v28  ;;  %v924_v30 = vpop.f32.mrb[5].mxu1 }
 0x22f   :  { %v743_v31 = vpop.f32.mrb[6].mxu1 }
 0x230   :  { %747 = vst [vmem:[#allocation9] sm:$0xff] %v741_v29  ;;  %v744_v32 = vadd.f32 %v822_v27, %v743_v31  ;;  %v925_v33 = vpop.f32.mrb[7].mxu1 }
 0x232   :  { %748 = vst [vmem:[#allocation9 + $0x8] sm:$0xff] %v744_v32 }
 0x233   :  { %1080 = shalt.err (!%p1077_p0)
}
 0x234   :  { %s1081_s12 = scalar_lea.hbm %s1204_s5, 256 }
 0x235   :  { %p1082_p1 = scmp.ne.s32.totalorder %s1204_s5, %s1081_s12  ;;  %p1085_p2 = scmp.lt.u32.totalorder %s1081_s12, %s1204_s5 }
 0x237   :  { %p1087_p3 = pnand %p1085_p2, %p1082_p1 }
 0x239   :  { %1090 = shalt.err (!%p1087_p3)
}
 0x23a   :  { %s1107_s1 = smov 128   ;;  %s1108_s17 = smov 8  }
 0x23b   :  { %760 = dma.vmem_to_hbm [thread:$0]  %s755_s10, 256, %s1204_s5, [#allocation5], %s1107_s1, %s1107_s1, %s1108_s17  }
 0x23c   :  { %1095 = dma.done.wait [#allocation5], 256  }
 0x23d   :  { %1096 = vsyncadd [#allocation5], 4294967040 }
 0x23e   :  { %764 = vsyncpa [#allocation4], 1 }
 0x23f   :  { %765 = vsyncpa [#allocation7], 1 }
 0x240   :  { %766 = vsyncpa [#allocation5], 1 }

</bundles_post_ra>
